<compile_context>
chip_gen: v7x
topology: tpu7x:2x2x1
jax: 0.10.0
libtpu: 0.0.40
codegen_flags: <defaults>
</compile_context>

<pallas_src>
import jax
import jax.numpy as jnp
from jax.experimental import pallas as pl
from jax.experimental.pallas import tpu as pltpu

NUM_LOC = 16          # number of locations / vocabulary rows
EMBED_SIZE = 128      # embedding width (lane-aligned, multiple of 128)
TOK_BLOCK_MAX = 2048  # max tokens gathered per grid step (1 MiB f32 output tile)
SPLIT_MIN = 512       # min tokens per block when splitting for >=2 grid steps


def _round_up(x, m):
    return ((x + m - 1) // m) * m


# ----------------------------------------------------------------------------
# Primary kernel: vectorized row gather (XLU dynamic gather via jnp.take).
# ----------------------------------------------------------------------------
def _embed_gather_kernel(tok_ref, emb_ref, out_ref):
    """tok_ref: i32[1, 1, tok_block] (lane-dense) | emb_ref: f32[num_loc, E]
    (resident) | out_ref: f32[tok_block, E]."""
    tok = tok_ref[0, 0, :]                       # (tok_block,) int32
    # jnp.take default mode is "clip" -> out-of-range indices are clamped.
    out_ref[...] = jnp.take(emb_ref[...], tok, axis=0)


# ----------------------------------------------------------------------------
# Fallback kernel: strip-mined select-accumulate (guaranteed lowering).
# ----------------------------------------------------------------------------
def _embed_select_kernel(tok_ref, emb_ref, out_ref):
    """tok_ref: i32[tok_block, 1] | emb_ref: f32[num_loc, E] | out_ref:
    f32[tok_block, E]. Accumulator is only `strip` rows (1-8 vregs)."""
    num_loc, embed_size = emb_ref.shape
    tok_block = out_ref.shape[0]
    strip = 64 if tok_block % 64 == 0 else 8
    n_strips = tok_block // strip

    emb = emb_ref[...]
    # Hoist table rows out of the per-strip r-loop (static slices, done once).
    rows = [emb[r, :][None, :] for r in range(num_loc)]   # (1, E) each

    def body(s, carry):
        start = pl.multiple_of(s * strip, strip)
        t = jnp.clip(tok_ref[pl.ds(start, strip), :], 0, num_loc - 1)  # (strip,1)
        acc = jnp.zeros((strip, embed_size), jnp.float32)
        for r in range(num_loc):                      # static, num_loc small
            acc = jnp.where(t == r, rows[r], acc)
        out_ref[pl.ds(start, strip), :] = acc
        return carry

    jax.lax.fori_loop(0, n_strips, body, 0, unroll=bool(n_strips <= 16))


# Cached result of the one-time gather-kernel probe (None = not probed yet).
_GATHER_OK = {"value": None}


def static_embed(embed_mat, token):
    """JAX wrapper reproducing StaticEmbed.forward(token) == embed_mat[token]."""
    embed_mat = jnp.asarray(embed_mat, jnp.float32)
    num_loc, embed_size = embed_mat.shape

    tok_shape = token.shape
    tok_flat = jnp.asarray(token, jnp.int32).reshape(-1)
    n_tok = int(tok_flat.shape[0])
    if n_tok == 0:  # edge case: empty token tensor
        return jnp.zeros(tok_shape + (embed_size,), jnp.float32)

    # Block sizing: big blocks for big inputs, minimal (8-aligned) for tiny
    # ones; keep >=2 grid steps once there is enough work (v7x dual-TC).
    n_rounded = _round_up(n_tok, 8)
    tok_block = min(TOK_BLOCK_MAX, n_rounded)
    if n_rounded >= 2 * SPLIT_MIN:
        tok_block = min(tok_block, _round_up(n_rounded // 2, 8))
    n_pad = _round_up(n_tok, tok_block)
    n_blocks = n_pad // tok_block

    tok_pad = tok_flat
    if n_pad != n_tok:
        tok_pad = jnp.pad(tok_flat, (0, n_pad - n_tok))  # pad -> row 0, sliced off

    common = dict(
        out_shape=jax.ShapeDtypeStruct((n_pad, embed_size), jnp.float32),
        grid=(n_blocks,),
        out_specs=pl.BlockSpec((tok_block, embed_size), lambda i: (i, 0)),
        compiler_params=pltpu.CompilerParams(dimension_semantics=("parallel",)),
    )

    def gather_call():
        tok3d = tok_pad.reshape(n_blocks, 1, tok_block)        # lane-dense tokens
        return pl.pallas_call(
            _embed_gather_kernel,
            in_specs=[
                pl.BlockSpec((1, 1, tok_block), lambda i: (i, 0, 0)),
                pl.BlockSpec((num_loc, embed_size), lambda i: (0, 0)),
            ],
            **common,
        )(tok3d, embed_mat)

    def select_call():
        tok_col = tok_pad.reshape(n_pad, 1)
        return pl.pallas_call(
            _embed_select_kernel,
            in_specs=[
                pl.BlockSpec((tok_block, 1), lambda i: (i, 0)),
                pl.BlockSpec((num_loc, embed_size), lambda i: (0, 0)),
            ],
            **common,
        )(tok_col, embed_mat)

    out_flat = None
    if _GATHER_OK["value"] is None:
        # One-time probe: compile + run the gather kernel and verify it is
        # bit-exact against jnp.take; otherwise fall back permanently.
        try:
            cand = gather_call()
            jax.block_until_ready(cand)
            ref = jnp.take(embed_mat, tok_pad, axis=0)
            ok = bool(jnp.array_equal(cand, ref))
            _GATHER_OK["value"] = ok
            if ok:
                out_flat = cand
        except Exception:
            _GATHER_OK["value"] = False

    if out_flat is None:
        out_flat = gather_call() if _GATHER_OK["value"] else select_call()

    if n_pad != n_tok:
        out_flat = out_flat[:n_tok]
    return out_flat.reshape(tok_shape + (embed_size,))


if __name__ == "__main__":
    key = jax.random.PRNGKey(0)
    k_emb, k_tok, k_tok2, k_tok3 = jax.random.split(key, 4)

    # Deterministic "embed_mat" (would be the numpy matrix passed to __init__).
    embed_mat = jax.random.normal(k_emb, (NUM_LOC, EMBED_SIZE), dtype=jnp.float32)

    # Token indices, shape (batch=2, seq=8).
    token = jax.random.randint(k_tok, (2, 8), 0, NUM_LOC, dtype=jnp.int32)
    out = static_embed(embed_mat, token)
    jax.block_until_ready(out)
    ref = jnp.take(embed_mat, token, axis=0)
    assert out.shape == (2, 8, EMBED_SIZE)
    assert out.dtype == jnp.float32
    assert jnp.array_equal(out, ref)

    # Padding / non-multiple-of-8 path.
    token2 = jax.random.randint(k_tok2, (3, 50), 0, NUM_LOC, dtype=jnp.int32)
    out2 = static_embed(embed_mat, token2)
    jax.block_until_ready(out2)
    assert jnp.array_equal(out2, jnp.take(embed_mat, token2, axis=0))

    # Multi-block / grid-split path (>= 2 grid steps).
    token3 = jax.random.randint(k_tok3, (4, 700), 0, NUM_LOC, dtype=jnp.int32)
    out3 = static_embed(embed_mat, token3)
    jax.block_until_ready(out3)
    assert jnp.array_equal(out3, jnp.take(embed_mat, token3, axis=0))

    print("KERNEL_OK")
</pallas_src>

<mosaic_0001>
module attributes {stable_mosaic.version = 11 : i64} {
  func.func @_embed_select_kernel(%arg0: i32, %arg1: memref<16x1xi32, #tpu.memory_space<vmem>>, %arg2: memref<16x128xf32, #tpu.memory_space<vmem>>, %arg3: memref<16x128xf32, #tpu.memory_space<vmem>>) attributes {dimension_semantics = [#tpu.dimension_semantics<parallel>], iteration_bounds = array<i64: 1>, scalar_prefetch = 0 : i64, scratch_operands = 0 : i64, tpu.core_type = #tpu.core_type<tc>, window_params = [{transform_indices = @transform_0, window_bounds = array<i64: 16, 1>}, {pipeline_mode = #tpu.pipeline_mode<synchronous>, transform_indices = @transform_1, window_bounds = array<i64: 16, 128>}, {transform_indices = @transform_2, window_bounds = array<i64: 16, 128>}]} {
    %c0 = arith.constant 0 : index
    %c0_0 = arith.constant 0 : index
    %0 = vector.load %arg2[%c0, %c0_0] : memref<16x128xf32, #tpu.memory_space<vmem>>, vector<16x128xf32>
    %1 = vector.extract_strided_slice %0 {offsets = [0, 0], sizes = [1, 128], strides = [1, 1]} : vector<16x128xf32> to vector<1x128xf32>
    %2 = vector.shape_cast %1 : vector<1x128xf32> to vector<128xf32>
    %3 = vector.shape_cast %2 : vector<128xf32> to vector<1x128xf32>
    %4 = vector.extract_strided_slice %0 {offsets = [1, 0], sizes = [1, 128], strides = [1, 1]} : vector<16x128xf32> to vector<1x128xf32>
    %5 = vector.shape_cast %4 : vector<1x128xf32> to vector<128xf32>
    %6 = vector.shape_cast %5 : vector<128xf32> to vector<1x128xf32>
    %7 = vector.extract_strided_slice %0 {offsets = [2, 0], sizes = [1, 128], strides = [1, 1]} : vector<16x128xf32> to vector<1x128xf32>
    %8 = vector.shape_cast %7 : vector<1x128xf32> to vector<128xf32>
    %9 = vector.shape_cast %8 : vector<128xf32> to vector<1x128xf32>
    %10 = vector.extract_strided_slice %0 {offsets = [3, 0], sizes = [1, 128], strides = [1, 1]} : vector<16x128xf32> to vector<1x128xf32>
    %11 = vector.shape_cast %10 : vector<1x128xf32> to vector<128xf32>
    %12 = vector.shape_cast %11 : vector<128xf32> to vector<1x128xf32>
    %13 = vector.extract_strided_slice %0 {offsets = [4, 0], sizes = [1, 128], strides = [1, 1]} : vector<16x128xf32> to vector<1x128xf32>
    %14 = vector.shape_cast %13 : vector<1x128xf32> to vector<128xf32>
    %15 = vector.shape_cast %14 : vector<128xf32> to vector<1x128xf32>
    %16 = vector.extract_strided_slice %0 {offsets = [5, 0], sizes = [1, 128], strides = [1, 1]} : vector<16x128xf32> to vector<1x128xf32>
    %17 = vector.shape_cast %16 : vector<1x128xf32> to vector<128xf32>
    %18 = vector.shape_cast %17 : vector<128xf32> to vector<1x128xf32>
    %19 = vector.extract_strided_slice %0 {offsets = [6, 0], sizes = [1, 128], strides = [1, 1]} : vector<16x128xf32> to vector<1x128xf32>
    %20 = vector.shape_cast %19 : vector<1x128xf32> to vector<128xf32>
    %21 = vector.shape_cast %20 : vector<128xf32> to vector<1x128xf32>
    %22 = vector.extract_strided_slice %0 {offsets = [7, 0], sizes = [1, 128], strides = [1, 1]} : vector<16x128xf32> to vector<1x128xf32>
    %23 = vector.shape_cast %22 : vector<1x128xf32> to vector<128xf32>
    %24 = vector.shape_cast %23 : vector<128xf32> to vector<1x128xf32>
    %25 = vector.extract_strided_slice %0 {offsets = [8, 0], sizes = [1, 128], strides = [1, 1]} : vector<16x128xf32> to vector<1x128xf32>
    %26 = vector.shape_cast %25 : vector<1x128xf32> to vector<128xf32>
    %27 = vector.shape_cast %26 : vector<128xf32> to vector<1x128xf32>
    %28 = vector.extract_strided_slice %0 {offsets = [9, 0], sizes = [1, 128], strides = [1, 1]} : vector<16x128xf32> to vector<1x128xf32>
    %29 = vector.shape_cast %28 : vector<1x128xf32> to vector<128xf32>
    %30 = vector.shape_cast %29 : vector<128xf32> to vector<1x128xf32>
    %31 = vector.extract_strided_slice %0 {offsets = [10, 0], sizes = [1, 128], strides = [1, 1]} : vector<16x128xf32> to vector<1x128xf32>
    %32 = vector.shape_cast %31 : vector<1x128xf32> to vector<128xf32>
    %33 = vector.shape_cast %32 : vector<128xf32> to vector<1x128xf32>
    %34 = vector.extract_strided_slice %0 {offsets = [11, 0], sizes = [1, 128], strides = [1, 1]} : vector<16x128xf32> to vector<1x128xf32>
    %35 = vector.shape_cast %34 : vector<1x128xf32> to vector<128xf32>
    %36 = vector.shape_cast %35 : vector<128xf32> to vector<1x128xf32>
    %37 = vector.extract_strided_slice %0 {offsets = [12, 0], sizes = [1, 128], strides = [1, 1]} : vector<16x128xf32> to vector<1x128xf32>
    %38 = vector.shape_cast %37 : vector<1x128xf32> to vector<128xf32>
    %39 = vector.shape_cast %38 : vector<128xf32> to vector<1x128xf32>
    %40 = vector.extract_strided_slice %0 {offsets = [13, 0], sizes = [1, 128], strides = [1, 1]} : vector<16x128xf32> to vector<1x128xf32>
    %41 = vector.shape_cast %40 : vector<1x128xf32> to vector<128xf32>
    %42 = vector.shape_cast %41 : vector<128xf32> to vector<1x128xf32>
    %43 = vector.extract_strided_slice %0 {offsets = [14, 0], sizes = [1, 128], strides = [1, 1]} : vector<16x128xf32> to vector<1x128xf32>
    %44 = vector.shape_cast %43 : vector<1x128xf32> to vector<128xf32>
    %45 = vector.shape_cast %44 : vector<128xf32> to vector<1x128xf32>
    %46 = vector.extract_strided_slice %0 {offsets = [15, 0], sizes = [1, 128], strides = [1, 1]} : vector<16x128xf32> to vector<1x128xf32>
    %47 = vector.shape_cast %46 : vector<1x128xf32> to vector<128xf32>
    %48 = vector.shape_cast %47 : vector<128xf32> to vector<1x128xf32>
    %c0_i32 = arith.constant 0 : i32
    %c8_i32 = arith.constant 8 : i32
    %49 = arith.muli %c0_i32, %c8_i32 : i32
    %50 = tpu.assume_multiple %49, 8 : i32
    %51 = arith.index_cast %50 : i32 to index
    %c0_1 = arith.constant 0 : index
    %52 = vector.load %arg1[%51, %c0_1] : memref<16x1xi32, #tpu.memory_space<vmem>>, vector<8x1xi32>
    %c0_i32_2 = arith.constant 0 : i32
    %c15_i32 = arith.constant 15 : i32
    %53 = vector.broadcast %c0_i32_2 : i32 to vector<8x1xi32>
    %54 = arith.maxsi %53, %52 : vector<8x1xi32>
    %55 = vector.broadcast %c15_i32 : i32 to vector<8x1xi32>
    %56 = arith.minsi %55, %54 : vector<8x1xi32>
    %cst = arith.constant 0.000000e+00 : f32
    %57 = vector.broadcast %cst : f32 to vector<8x128xf32>
    %c0_i32_3 = arith.constant 0 : i32
    %58 = vector.broadcast %c0_i32_3 : i32 to vector<8x1xi32>
    %59 = arith.cmpi eq, %56, %58 : vector<8x1xi32>
    %60 = vector.shape_cast %59 : vector<8x1xi1> to vector<8x1xi1>
    %61 = vector.broadcast %60 : vector<8x1xi1> to vector<8x128xi1>
    %62 = vector.shape_cast %3 : vector<1x128xf32> to vector<1x128xf32>
    %63 = vector.broadcast %62 : vector<1x128xf32> to vector<8x128xf32>
    %64 = arith.select %61, %63, %57 : vector<8x128xi1>, vector<8x128xf32>
    %c1_i32 = arith.constant 1 : i32
    %65 = vector.broadcast %c1_i32 : i32 to vector<8x1xi32>
    %66 = arith.cmpi eq, %56, %65 : vector<8x1xi32>
    %67 = vector.shape_cast %66 : vector<8x1xi1> to vector<8x1xi1>
    %68 = vector.broadcast %67 : vector<8x1xi1> to vector<8x128xi1>
    %69 = vector.shape_cast %6 : vector<1x128xf32> to vector<1x128xf32>
    %70 = vector.broadcast %69 : vector<1x128xf32> to vector<8x128xf32>
    %71 = arith.select %68, %70, %64 : vector<8x128xi1>, vector<8x128xf32>
    %c2_i32 = arith.constant 2 : i32
    %72 = vector.broadcast %c2_i32 : i32 to vector<8x1xi32>
    %73 = arith.cmpi eq, %56, %72 : vector<8x1xi32>
    %74 = vector.shape_cast %73 : vector<8x1xi1> to vector<8x1xi1>
    %75 = vector.broadcast %74 : vector<8x1xi1> to vector<8x128xi1>
    %76 = vector.shape_cast %9 : vector<1x128xf32> to vector<1x128xf32>
    %77 = vector.broadcast %76 : vector<1x128xf32> to vector<8x128xf32>
    %78 = arith.select %75, %77, %71 : vector<8x128xi1>, vector<8x128xf32>
    %c3_i32 = arith.constant 3 : i32
    %79 = vector.broadcast %c3_i32 : i32 to vector<8x1xi32>
    %80 = arith.cmpi eq, %56, %79 : vector<8x1xi32>
    %81 = vector.shape_cast %80 : vector<8x1xi1> to vector<8x1xi1>
    %82 = vector.broadcast %81 : vector<8x1xi1> to vector<8x128xi1>
    %83 = vector.shape_cast %12 : vector<1x128xf32> to vector<1x128xf32>
    %84 = vector.broadcast %83 : vector<1x128xf32> to vector<8x128xf32>
    %85 = arith.select %82, %84, %78 : vector<8x128xi1>, vector<8x128xf32>
    %c4_i32 = arith.constant 4 : i32
    %86 = vector.broadcast %c4_i32 : i32 to vector<8x1xi32>
    %87 = arith.cmpi eq, %56, %86 : vector<8x1xi32>
    %88 = vector.shape_cast %87 : vector<8x1xi1> to vector<8x1xi1>
    %89 = vector.broadcast %88 : vector<8x1xi1> to vector<8x128xi1>
    %90 = vector.shape_cast %15 : vector<1x128xf32> to vector<1x128xf32>
    %91 = vector.broadcast %90 : vector<1x128xf32> to vector<8x128xf32>
    %92 = arith.select %89, %91, %85 : vector<8x128xi1>, vector<8x128xf32>
    %c5_i32 = arith.constant 5 : i32
    %93 = vector.broadcast %c5_i32 : i32 to vector<8x1xi32>
    %94 = arith.cmpi eq, %56, %93 : vector<8x1xi32>
    %95 = vector.shape_cast %94 : vector<8x1xi1> to vector<8x1xi1>
    %96 = vector.broadcast %95 : vector<8x1xi1> to vector<8x128xi1>
    %97 = vector.shape_cast %18 : vector<1x128xf32> to vector<1x128xf32>
    %98 = vector.broadcast %97 : vector<1x128xf32> to vector<8x128xf32>
    %99 = arith.select %96, %98, %92 : vector<8x128xi1>, vector<8x128xf32>
    %c6_i32 = arith.constant 6 : i32
    %100 = vector.broadcast %c6_i32 : i32 to vector<8x1xi32>
    %101 = arith.cmpi eq, %56, %100 : vector<8x1xi32>
    %102 = vector.shape_cast %101 : vector<8x1xi1> to vector<8x1xi1>
    %103 = vector.broadcast %102 : vector<8x1xi1> to vector<8x128xi1>
    %104 = vector.shape_cast %21 : vector<1x128xf32> to vector<1x128xf32>
    %105 = vector.broadcast %104 : vector<1x128xf32> to vector<8x128xf32>
    %106 = arith.select %103, %105, %99 : vector<8x128xi1>, vector<8x128xf32>
    %c7_i32 = arith.constant 7 : i32
    %107 = vector.broadcast %c7_i32 : i32 to vector<8x1xi32>
    %108 = arith.cmpi eq, %56, %107 : vector<8x1xi32>
    %109 = vector.shape_cast %108 : vector<8x1xi1> to vector<8x1xi1>
    %110 = vector.broadcast %109 : vector<8x1xi1> to vector<8x128xi1>
    %111 = vector.shape_cast %24 : vector<1x128xf32> to vector<1x128xf32>
    %112 = vector.broadcast %111 : vector<1x128xf32> to vector<8x128xf32>
    %113 = arith.select %110, %112, %106 : vector<8x128xi1>, vector<8x128xf32>
    %c8_i32_4 = arith.constant 8 : i32
    %114 = vector.broadcast %c8_i32_4 : i32 to vector<8x1xi32>
    %115 = arith.cmpi eq, %56, %114 : vector<8x1xi32>
    %116 = vector.shape_cast %115 : vector<8x1xi1> to vector<8x1xi1>
    %117 = vector.broadcast %116 : vector<8x1xi1> to vector<8x128xi1>
    %118 = vector.shape_cast %27 : vector<1x128xf32> to vector<1x128xf32>
    %119 = vector.broadcast %118 : vector<1x128xf32> to vector<8x128xf32>
    %120 = arith.select %117, %119, %113 : vector<8x128xi1>, vector<8x128xf32>
    %c9_i32 = arith.constant 9 : i32
    %121 = vector.broadcast %c9_i32 : i32 to vector<8x1xi32>
    %122 = arith.cmpi eq, %56, %121 : vector<8x1xi32>
    %123 = vector.shape_cast %122 : vector<8x1xi1> to vector<8x1xi1>
    %124 = vector.broadcast %123 : vector<8x1xi1> to vector<8x128xi1>
    %125 = vector.shape_cast %30 : vector<1x128xf32> to vector<1x128xf32>
    %126 = vector.broadcast %125 : vector<1x128xf32> to vector<8x128xf32>
    %127 = arith.select %124, %126, %120 : vector<8x128xi1>, vector<8x128xf32>
    %c10_i32 = arith.constant 10 : i32
    %128 = vector.broadcast %c10_i32 : i32 to vector<8x1xi32>
    %129 = arith.cmpi eq, %56, %128 : vector<8x1xi32>
    %130 = vector.shape_cast %129 : vector<8x1xi1> to vector<8x1xi1>
    %131 = vector.broadcast %130 : vector<8x1xi1> to vector<8x128xi1>
    %132 = vector.shape_cast %33 : vector<1x128xf32> to vector<1x128xf32>
    %133 = vector.broadcast %132 : vector<1x128xf32> to vector<8x128xf32>
    %134 = arith.select %131, %133, %127 : vector<8x128xi1>, vector<8x128xf32>
    %c11_i32 = arith.constant 11 : i32
    %135 = vector.broadcast %c11_i32 : i32 to vector<8x1xi32>
    %136 = arith.cmpi eq, %56, %135 : vector<8x1xi32>
    %137 = vector.shape_cast %136 : vector<8x1xi1> to vector<8x1xi1>
    %138 = vector.broadcast %137 : vector<8x1xi1> to vector<8x128xi1>
    %139 = vector.shape_cast %36 : vector<1x128xf32> to vector<1x128xf32>
    %140 = vector.broadcast %139 : vector<1x128xf32> to vector<8x128xf32>
    %141 = arith.select %138, %140, %134 : vector<8x128xi1>, vector<8x128xf32>
    %c12_i32 = arith.constant 12 : i32
    %142 = vector.broadcast %c12_i32 : i32 to vector<8x1xi32>
    %143 = arith.cmpi eq, %56, %142 : vector<8x1xi32>
    %144 = vector.shape_cast %143 : vector<8x1xi1> to vector<8x1xi1>
    %145 = vector.broadcast %144 : vector<8x1xi1> to vector<8x128xi1>
    %146 = vector.shape_cast %39 : vector<1x128xf32> to vector<1x128xf32>
    %147 = vector.broadcast %146 : vector<1x128xf32> to vector<8x128xf32>
    %148 = arith.select %145, %147, %141 : vector<8x128xi1>, vector<8x128xf32>
    %c13_i32 = arith.constant 13 : i32
    %149 = vector.broadcast %c13_i32 : i32 to vector<8x1xi32>
    %150 = arith.cmpi eq, %56, %149 : vector<8x1xi32>
    %151 = vector.shape_cast %150 : vector<8x1xi1> to vector<8x1xi1>
    %152 = vector.broadcast %151 : vector<8x1xi1> to vector<8x128xi1>
    %153 = vector.shape_cast %42 : vector<1x128xf32> to vector<1x128xf32>
    %154 = vector.broadcast %153 : vector<1x128xf32> to vector<8x128xf32>
    %155 = arith.select %152, %154, %148 : vector<8x128xi1>, vector<8x128xf32>
    %c14_i32 = arith.constant 14 : i32
    %156 = vector.broadcast %c14_i32 : i32 to vector<8x1xi32>
    %157 = arith.cmpi eq, %56, %156 : vector<8x1xi32>
    %158 = vector.shape_cast %157 : vector<8x1xi1> to vector<8x1xi1>
    %159 = vector.broadcast %158 : vector<8x1xi1> to vector<8x128xi1>
    %160 = vector.shape_cast %45 : vector<1x128xf32> to vector<1x128xf32>
    %161 = vector.broadcast %160 : vector<1x128xf32> to vector<8x128xf32>
    %162 = arith.select %159, %161, %155 : vector<8x128xi1>, vector<8x128xf32>
    %c15_i32_5 = arith.constant 15 : i32
    %163 = vector.broadcast %c15_i32_5 : i32 to vector<8x1xi32>
    %164 = arith.cmpi eq, %56, %163 : vector<8x1xi32>
    %165 = vector.shape_cast %164 : vector<8x1xi1> to vector<8x1xi1>
    %166 = vector.broadcast %165 : vector<8x1xi1> to vector<8x128xi1>
    %167 = vector.shape_cast %48 : vector<1x128xf32> to vector<1x128xf32>
    %168 = vector.broadcast %167 : vector<1x128xf32> to vector<8x128xf32>
    %169 = arith.select %166, %168, %162 : vector<8x128xi1>, vector<8x128xf32>
    %170 = arith.index_cast %50 : i32 to index
    %c0_6 = arith.constant 0 : index
    %171 = vector.load %arg3[%170, %c0_6] : memref<16x128xf32, #tpu.memory_space<vmem>>, vector<8x128xf32>
    tpu.vector_store %arg3[%170, %c0_6], %169 {strides = array<i32>} : memref<16x128xf32, #tpu.memory_space<vmem>>, vector<8x128xf32>,
    %c1_i32_7 = arith.constant 1 : i32
    %c8_i32_8 = arith.constant 8 : i32
    %172 = arith.muli %c1_i32_7, %c8_i32_8 : i32
    %173 = tpu.assume_multiple %172, 8 : i32
    %174 = arith.index_cast %173 : i32 to index
    %c0_9 = arith.constant 0 : index
    %175 = vector.load %arg1[%174, %c0_9] : memref<16x1xi32, #tpu.memory_space<vmem>>, vector<8x1xi32>
    %c0_i32_10 = arith.constant 0 : i32
    %c15_i32_11 = arith.constant 15 : i32
    %176 = vector.broadcast %c0_i32_10 : i32 to vector<8x1xi32>
    %177 = arith.maxsi %176, %175 : vector<8x1xi32>
    %178 = vector.broadcast %c15_i32_11 : i32 to vector<8x1xi32>
    %179 = arith.minsi %178, %177 : vector<8x1xi32>
    %cst_12 = arith.constant 0.000000e+00 : f32
    %180 = vector.broadcast %cst_12 : f32 to vector<8x128xf32>
    %c0_i32_13 = arith.constant 0 : i32
    %181 = vector.broadcast %c0_i32_13 : i32 to vector<8x1xi32>
    %182 = arith.cmpi eq, %179, %181 : vector<8x1xi32>
    %183 = vector.shape_cast %182 : vector<8x1xi1> to vector<8x1xi1>
    %184 = vector.broadcast %183 : vector<8x1xi1> to vector<8x128xi1>
    %185 = vector.shape_cast %3 : vector<1x128xf32> to vector<1x128xf32>
    %186 = vector.broadcast %185 : vector<1x128xf32> to vector<8x128xf32>
    %187 = arith.select %184, %186, %180 : vector<8x128xi1>, vector<8x128xf32>
    %c1_i32_14 = arith.constant 1 : i32
    %188 = vector.broadcast %c1_i32_14 : i32 to vector<8x1xi32>
    %189 = arith.cmpi eq, %179, %188 : vector<8x1xi32>
    %190 = vector.shape_cast %189 : vector<8x1xi1> to vector<8x1xi1>
    %191 = vector.broadcast %190 : vector<8x1xi1> to vector<8x128xi1>
    %192 = vector.shape_cast %6 : vector<1x128xf32> to vector<1x128xf32>
    %193 = vector.broadcast %192 : vector<1x128xf32> to vector<8x128xf32>
    %194 = arith.select %191, %193, %187 : vector<8x128xi1>, vector<8x128xf32>
    %c2_i32_15 = arith.constant 2 : i32
    %195 = vector.broadcast %c2_i32_15 : i32 to vector<8x1xi32>
    %196 = arith.cmpi eq, %179, %195 : vector<8x1xi32>
    %197 = vector.shape_cast %196 : vector<8x1xi1> to vector<8x1xi1>
    %198 = vector.broadcast %197 : vector<8x1xi1> to vector<8x128xi1>
    %199 = vector.shape_cast %9 : vector<1x128xf32> to vector<1x128xf32>
    %200 = vector.broadcast %199 : vector<1x128xf32> to vector<8x128xf32>
    %201 = arith.select %198, %200, %194 : vector<8x128xi1>, vector<8x128xf32>
    %c3_i32_16 = arith.constant 3 : i32
    %202 = vector.broadcast %c3_i32_16 : i32 to vector<8x1xi32>
    %203 = arith.cmpi eq, %179, %202 : vector<8x1xi32>
    %204 = vector.shape_cast %203 : vector<8x1xi1> to vector<8x1xi1>
    %205 = vector.broadcast %204 : vector<8x1xi1> to vector<8x128xi1>
    %206 = vector.shape_cast %12 : vector<1x128xf32> to vector<1x128xf32>
    %207 = vector.broadcast %206 : vector<1x128xf32> to vector<8x128xf32>
    %208 = arith.select %205, %207, %201 : vector<8x128xi1>, vector<8x128xf32>
    %c4_i32_17 = arith.constant 4 : i32
    %209 = vector.broadcast %c4_i32_17 : i32 to vector<8x1xi32>
    %210 = arith.cmpi eq, %179, %209 : vector<8x1xi32>
    %211 = vector.shape_cast %210 : vector<8x1xi1> to vector<8x1xi1>
    %212 = vector.broadcast %211 : vector<8x1xi1> to vector<8x128xi1>
    %213 = vector.shape_cast %15 : vector<1x128xf32> to vector<1x128xf32>
    %214 = vector.broadcast %213 : vector<1x128xf32> to vector<8x128xf32>
    %215 = arith.select %212, %214, %208 : vector<8x128xi1>, vector<8x128xf32>
    %c5_i32_18 = arith.constant 5 : i32
    %216 = vector.broadcast %c5_i32_18 : i32 to vector<8x1xi32>
    %217 = arith.cmpi eq, %179, %216 : vector<8x1xi32>
    %218 = vector.shape_cast %217 : vector<8x1xi1> to vector<8x1xi1>
    %219 = vector.broadcast %218 : vector<8x1xi1> to vector<8x128xi1>
    %220 = vector.shape_cast %18 : vector<1x128xf32> to vector<1x128xf32>
    %221 = vector.broadcast %220 : vector<1x128xf32> to vector<8x128xf32>
    %222 = arith.select %219, %221, %215 : vector<8x128xi1>, vector<8x128xf32>
    %c6_i32_19 = arith.constant 6 : i32
    %223 = vector.broadcast %c6_i32_19 : i32 to vector<8x1xi32>
    %224 = arith.cmpi eq, %179, %223 : vector<8x1xi32>
    %225 = vector.shape_cast %224 : vector<8x1xi1> to vector<8x1xi1>
    %226 = vector.broadcast %225 : vector<8x1xi1> to vector<8x128xi1>
    %227 = vector.shape_cast %21 : vector<1x128xf32> to vector<1x128xf32>
    %228 = vector.broadcast %227 : vector<1x128xf32> to vector<8x128xf32>
    %229 = arith.select %226, %228, %222 : vector<8x128xi1>, vector<8x128xf32>
    %c7_i32_20 = arith.constant 7 : i32
    %230 = vector.broadcast %c7_i32_20 : i32 to vector<8x1xi32>
    %231 = arith.cmpi eq, %179, %230 : vector<8x1xi32>
    %232 = vector.shape_cast %231 : vector<8x1xi1> to vector<8x1xi1>
    %233 = vector.broadcast %232 : vector<8x1xi1> to vector<8x128xi1>
    %234 = vector.shape_cast %24 : vector<1x128xf32> to vector<1x128xf32>
    %235 = vector.broadcast %234 : vector<1x128xf32> to vector<8x128xf32>
    %236 = arith.select %233, %235, %229 : vector<8x128xi1>, vector<8x128xf32>
    %c8_i32_21 = arith.constant 8 : i32
    %237 = vector.broadcast %c8_i32_21 : i32 to vector<8x1xi32>
    %238 = arith.cmpi eq, %179, %237 : vector<8x1xi32>
    %239 = vector.shape_cast %238 : vector<8x1xi1> to vector<8x1xi1>
    %240 = vector.broadcast %239 : vector<8x1xi1> to vector<8x128xi1>
    %241 = vector.shape_cast %27 : vector<1x128xf32> to vector<1x128xf32>
    %242 = vector.broadcast %241 : vector<1x128xf32> to vector<8x128xf32>
    %243 = arith.select %240, %242, %236 : vector<8x128xi1>, vector<8x128xf32>
    %c9_i32_22 = arith.constant 9 : i32
    %244 = vector.broadcast %c9_i32_22 : i32 to vector<8x1xi32>
    %245 = arith.cmpi eq, %179, %244 : vector<8x1xi32>
    %246 = vector.shape_cast %245 : vector<8x1xi1> to vector<8x1xi1>
    %247 = vector.broadcast %246 : vector<8x1xi1> to vector<8x128xi1>
    %248 = vector.shape_cast %30 : vector<1x128xf32> to vector<1x128xf32>
    %249 = vector.broadcast %248 : vector<1x128xf32> to vector<8x128xf32>
    %250 = arith.select %247, %249, %243 : vector<8x128xi1>, vector<8x128xf32>
    %c10_i32_23 = arith.constant 10 : i32
    %251 = vector.broadcast %c10_i32_23 : i32 to vector<8x1xi32>
    %252 = arith.cmpi eq, %179, %251 : vector<8x1xi32>
    %253 = vector.shape_cast %252 : vector<8x1xi1> to vector<8x1xi1>
    %254 = vector.broadcast %253 : vector<8x1xi1> to vector<8x128xi1>
    %255 = vector.shape_cast %33 : vector<1x128xf32> to vector<1x128xf32>
    %256 = vector.broadcast %255 : vector<1x128xf32> to vector<8x128xf32>
    %257 = arith.select %254, %256, %250 : vector<8x128xi1>, vector<8x128xf32>
    %c11_i32_24 = arith.constant 11 : i32
    %258 = vector.broadcast %c11_i32_24 : i32 to vector<8x1xi32>
    %259 = arith.cmpi eq, %179, %258 : vector<8x1xi32>
    %260 = vector.shape_cast %259 : vector<8x1xi1> to vector<8x1xi1>
    %261 = vector.broadcast %260 : vector<8x1xi1> to vector<8x128xi1>
    %262 = vector.shape_cast %36 : vector<1x128xf32> to vector<1x128xf32>
    %263 = vector.broadcast %262 : vector<1x128xf32> to vector<8x128xf32>
    %264 = arith.select %261, %263, %257 : vector<8x128xi1>, vector<8x128xf32>
    %c12_i32_25 = arith.constant 12 : i32
    %265 = vector.broadcast %c12_i32_25 : i32 to vector<8x1xi32>
    %266 = arith.cmpi eq, %179, %265 : vector<8x1xi32>
    %267 = vector.shape_cast %266 : vector<8x1xi1> to vector<8x1xi1>
    %268 = vector.broadcast %267 : vector<8x1xi1> to vector<8x128xi1>
    %269 = vector.shape_cast %39 : vector<1x128xf32> to vector<1x128xf32>
    %270 = vector.broadcast %269 : vector<1x128xf32> to vector<8x128xf32>
    %271 = arith.select %268, %270, %264 : vector<8x128xi1>, vector<8x128xf32>
    %c13_i32_26 = arith.constant 13 : i32
    %272 = vector.broadcast %c13_i32_26 : i32 to vector<8x1xi32>
    %273 = arith.cmpi eq, %179, %272 : vector<8x1xi32>
    %274 = vector.shape_cast %273 : vector<8x1xi1> to vector<8x1xi1>
    %275 = vector.broadcast %274 : vector<8x1xi1> to vector<8x128xi1>
    %276 = vector.shape_cast %42 : vector<1x128xf32> to vector<1x128xf32>
    %277 = vector.broadcast %276 : vector<1x128xf32> to vector<8x128xf32>
    %278 = arith.select %275, %277, %271 : vector<8x128xi1>, vector<8x128xf32>
    %c14_i32_27 = arith.constant 14 : i32
    %279 = vector.broadcast %c14_i32_27 : i32 to vector<8x1xi32>
    %280 = arith.cmpi eq, %179, %279 : vector<8x1xi32>
    %281 = vector.shape_cast %280 : vector<8x1xi1> to vector<8x1xi1>
    %282 = vector.broadcast %281 : vector<8x1xi1> to vector<8x128xi1>
    %283 = vector.shape_cast %45 : vector<1x128xf32> to vector<1x128xf32>
    %284 = vector.broadcast %283 : vector<1x128xf32> to vector<8x128xf32>
    %285 = arith.select %282, %284, %278 : vector<8x128xi1>, vector<8x128xf32>
    %c15_i32_28 = arith.constant 15 : i32
    %286 = vector.broadcast %c15_i32_28 : i32 to vector<8x1xi32>
    %287 = arith.cmpi eq, %179, %286 : vector<8x1xi32>
    %288 = vector.shape_cast %287 : vector<8x1xi1> to vector<8x1xi1>
    %289 = vector.broadcast %288 : vector<8x1xi1> to vector<8x128xi1>
    %290 = vector.shape_cast %48 : vector<1x128xf32> to vector<1x128xf32>
    %291 = vector.broadcast %290 : vector<1x128xf32> to vector<8x128xf32>
    %292 = arith.select %289, %291, %285 : vector<8x128xi1>, vector<8x128xf32>
    %293 = arith.index_cast %173 : i32 to index
    %c0_29 = arith.constant 0 : index
    %294 = vector.load %arg3[%293, %c0_29] : memref<16x128xf32, #tpu.memory_space<vmem>>, vector<8x128xf32>
    tpu.vector_store %arg3[%293, %c0_29], %292 {strides = array<i32>} : memref<16x128xf32, #tpu.memory_space<vmem>>, vector<8x128xf32>,
    %c2_i32_30 = arith.constant 2 : i32
    return
  }
  func.func @transform_0(%arg0: i32) -> (i32, i32) {
    %c0_i32 = arith.constant 0 : i32
    %c0_i32_0 = arith.constant 0 : i32
    return %arg0, %c0_i32 : i32, i32
  }
  func.func @transform_1(%arg0: i32) -> (i32, i32) {
    %c0_i32 = arith.constant 0 : i32
    %c0_i32_0 = arith.constant 0 : i32
    %c0_i32_1 = arith.constant 0 : i32
    return %c0_i32, %c0_i32_0 : i32, i32
  }
  func.func @transform_2(%arg0: i32) -> (i32, i32) {
    %c0_i32 = arith.constant 0 : i32
    %c0_i32_0 = arith.constant 0 : i32
    return %arg0, %c0_i32 : i32, i32
  }
}

</mosaic_0001>

<bundles_post_ra>
// kernel: tpu_custom_call.1
= control target key start
LH: loop header
LB: loop body
LE: loop exit
PB: predicated region body
PF: predicated region fallthrough
CT: control target
= control target key end

     0   :  { %s521_s0 = inlined_call_operand.vmem [shape: s32[16,1], index: 0, kind: input, shape index: {}]   ;;  %s522_s1 = inlined_call_operand.vmem [shape: f32[16,128], index: 1, kind: input, shape index: {}]   ;;  %s523_s2 = inlined_call_operand.hbm [shape: f32[16,128], index: 2, kind: output, shape index: {}]  }
   0x1   :  { %v14_v0 = vld [vmem:[%s521_s0] sm:$0xff] }
   0x2   :  { %7 = vsyncpa [#allocation3], 0  ;;  %v363_v1 = vmov 0   ;;  %vm15_vm0 = vcmp.gt.s32.totalorder %v14_v0, 0  ;;  %v332_v8 = vld [vmem:[%s521_s0 + $0x8] sm:$0xff]  ;;  %v25_v49 = vlaneseq  ;;  %v12_v56 = vld [vmem:[%s522_s1] sm:$0xff] }
   0x3   :  { %338 = vset.pattern.permute.xlu1 %v363_v1  ;;  %337 = vset.pattern.permute.xlu0 %v363_v1  ;;  %v16_v2 = vsel %vm15_vm0, %v14_v0, 0  ;;  %vm198_vm10 = vcmp.gt.s32.totalorder %v332_v8, 0 }
   0x4   :  { %vm17_vm1 = vcmp.lt.s32.totalorder %v16_v2, 15  ;;  %v199_v13 = vsel %vm198_vm10, %v332_v8, 0  ;;  %v472_v52 = vshrl.u32 %v25_v49, 7 }
   0x5   :  { %v387_v3 = vsel %vm17_vm1, %v16_v2, 15  ;;  %vm200_vm13 = vcmp.lt.s32.totalorder %v199_v13, 15 }
   0x6   :  { %vm41_vm2 = vcmp.eq.s32.totalorder %v387_v3, 2  ;;  %vm19_vm3 = vcmp.eq.s32.totalorder %v387_v3, 0  ;;  %vm52_vm4 = vcmp.eq.s32.totalorder %v387_v3, 3  ;;  %vm30_vm5 = vcmp.eq.s32.totalorder %v387_v3, 1 }
   0x7   :  { %v42_v4 = vsel %vm41_vm2, 1, %v363_v1  ;;  %v20_v5 = vsel %vm19_vm3, 1, %v363_v1  ;;  %v53_v6 = vsel %vm52_vm4, 1, %v363_v1  ;;  %v31_v7 = vsel %vm30_vm5, 1, %v363_v1 }
   0x8   :  { %44 = vperm.xlu1 %338, %v42_v4   ;;  %22 = vperm.xlu0 %337, %v20_v5   ;;  %vm74_vm6 = vcmp.eq.s32.totalorder %v387_v3, 5  ;;  %vm63_vm7 = vcmp.eq.s32.totalorder %v387_v3, 4  ;;  %vm96_vm8 = vcmp.eq.s32.totalorder %v387_v3, 7  ;;  %vm85_vm9 = vcmp.eq.s32.totalorder %v387_v3, 6 }
   0x9   :  { %v75_v9 = vsel %vm74_vm6, 1, %v363_v1  ;;  %v64_v10 = vsel %vm63_vm7, 1, %v363_v1  ;;  %v97_v11 = vsel %vm96_vm8, 1, %v363_v1  ;;  %v86_v12 = vsel %vm85_vm9, 1, %v363_v1 }
   0xa   :  { %vm118_vm11 = vcmp.eq.s32.totalorder %v387_v3, 9  ;;  %vm107_vm12 = vcmp.eq.s32.totalorder %v387_v3, 8  ;;  %vm140_vm14 = vcmp.eq.s32.totalorder %v387_v3, 11  ;;  %vm129_vm15 = vcmp.eq.s32.totalorder %v387_v3, 10 }
   0xb   :  { %v119_v14 = vsel %vm118_vm11, 1, %v363_v1  ;;  %v108_v15 = vsel %vm107_vm12, 1, %v363_v1  ;;  %v414_v16 = vsel %vm200_vm13, %v199_v13, 15  ;;  %v141_v17 = vsel %vm140_vm14, 1, %v363_v1 }
   0xc   :  { %55 = vperm.xlu1 %338, %v53_v6   ;;  %33 = vperm.xlu0 %337, %v31_v7   ;;  %v130_v18 = vsel %vm129_vm15, 1, %v363_v1  ;;  %vm209_vm0 = vcmp.eq.s32.totalorder %v414_v16, 1  ;;  %vm202_vm1 = vcmp.eq.s32.totalorder %v414_v16, 0  ;;  %vm223_vm2 = vcmp.eq.s32.totalorder %v414_v16, 3 }
   0xd   :  { %v210_v19 = vsel %vm209_vm0, 1, %v363_v1  ;;  %v203_v20 = vsel %vm202_vm1, 1, %v363_v1  ;;  %vm216_vm3 = vcmp.eq.s32.totalorder %v414_v16, 2  ;;  %v224_v21 = vsel %vm223_vm2, 1, %v363_v1 }
   0xe   :  { %v217_v22 = vsel %vm216_vm3, 1, %v363_v1  ;;  %vm237_vm4 = vcmp.eq.s32.totalorder %v414_v16, 5  ;;  %vm230_vm5 = vcmp.eq.s32.totalorder %v414_v16, 4  ;;  %vm251_vm6 = vcmp.eq.s32.totalorder %v414_v16, 7 }
   0xf   :  { %v238_v23 = vsel %vm237_vm4, 1, %v363_v1  ;;  %v231_v24 = vsel %vm230_vm5, 1, %v363_v1  ;;  %vm244_vm7 = vcmp.eq.s32.totalorder %v414_v16, 6  ;;  %v252_v25 = vsel %vm251_vm6, 1, %v363_v1 }
  0x10   :  { %77 = vperm.xlu1 %338, %v75_v9   ;;  %66 = vperm.xlu0 %337, %v64_v10   ;;  %v245_v26 = vsel %vm244_vm7, 1, %v363_v1  ;;  %vm265_vm8 = vcmp.eq.s32.totalorder %v414_v16, 9  ;;  %vm258_vm9 = vcmp.eq.s32.totalorder %v414_v16, 8  ;;  %vm279_vm10 = vcmp.eq.s32.totalorder %v414_v16, 11 }
  0x11   :  { %v266_v27 = vsel %vm265_vm8, 1, %v363_v1  ;;  %v259_v28 = vsel %vm258_vm9, 1, %v363_v1  ;;  %vm272_vm11 = vcmp.eq.s32.totalorder %v414_v16, 10  ;;  %v280_v29 = vsel %vm279_vm10, 1, %v363_v1 }
  0x12   :  { %v273_v30 = vsel %vm272_vm11, 1, %v363_v1  ;;  %vm286_vm12 = vcmp.eq.s32.totalorder %v414_v16, 12  ;;  %vm151_vm13 = vcmp.eq.s32.totalorder %v387_v3, 12  ;;  %vm293_vm14 = vcmp.eq.s32.totalorder %v414_v16, 13 }
  0x13   :  { %v287_v31 = vsel %vm286_vm12, 1, %v363_v1  ;;  %v152_v32 = vsel %vm151_vm13, 1, %v363_v1  ;;  %vm162_vm15 = vcmp.eq.s32.totalorder %v387_v3, 13  ;;  %v294_v33 = vsel %vm293_vm14, 1, %v363_v1 }
  0x14   :  { %99 = vperm.xlu1 %338, %v97_v11   ;;  %88 = vperm.xlu0 %337, %v86_v12   ;;  %v163_v34 = vsel %vm162_vm15, 1, %v363_v1  ;;  %vm300_vm0 = vcmp.eq.s32.totalorder %v414_v16, 14  ;;  %vm173_vm1 = vcmp.eq.s32.totalorder %v387_v3, 14  ;;  %vm307_vm2 = vcmp.eq.s32.totalorder %v414_v16, 15 }
  0x15   :  { %v301_v35 = vsel %vm300_vm0, 1, %v363_v1  ;;  %v174_v36 = vsel %vm173_vm1, 1, %v363_v1  ;;  %vm184_vm3 = vcmp.eq.s32.totalorder %v387_v3, 15  ;;  %v308_v37 = vsel %vm307_vm2, 1, %v363_v1 }
  0x16   :  { %v185_v38 = vsel %vm184_vm3, 1, %v363_v1  ;;  %v27_v55 = vsub.s32 0, %v472_v52  ;;  %v38_v57 = vsub.s32 1, %v472_v52  ;;  %v49_v61 = vsub.s32 2, %v472_v52 }
  0x17   :  { %v60_v63 = vsub.s32 3, %v472_v52  ;;  %v71_v5 = vsub.s32 4, %v472_v52  ;;  %v82_v11 = vsub.s32 5, %v472_v52  ;;  %v93_v12 = vsub.s32 6, %v472_v52 }
  0x18   :  { %121 = vperm.xlu1 %338, %v119_v14   ;;  %110 = vperm.xlu0 %337, %v108_v15   ;;  %v28_v60 = vrot.slane %v12_v56, %v27_v55  ;;  %v39_v62 = vrot.slane %v12_v56, %v38_v57  ;;  %v50_v3 = vrot.slane %v12_v56, %v49_v61 }
  0x19   :  { %v61_v7 = vrot.slane %v12_v56, %v60_v63  ;;  %v72_v14 = vrot.slane %v12_v56, %v71_v5 }
  0x1c   :  { %143 = vperm.xlu1 %338, %v141_v17   ;;  %132 = vperm.xlu0 %337, %v130_v18  }
  0x20   :  { %212 = vperm.xlu1 %338, %v210_v19   ;;  %205 = vperm.xlu0 %337, %v203_v20   ;;  %v83_v19 = vrot.slane %v12_v56, %v82_v11  ;;  %v94_v20 = vrot.slane %v12_v56, %v93_v12 }
  0x24   :  { %226 = vperm.xlu1 %338, %v224_v21   ;;  %219 = vperm.xlu0 %337, %v217_v22   ;;  %v104_v21 = vsub.s32 7, %v472_v52 }
  0x28   :  { %240 = vperm.xlu1 %338, %v238_v23   ;;  %233 = vperm.xlu0 %337, %v231_v24   ;;  %v13_v24 = vld [vmem:[%s522_s1 + $0x8] sm:$0xff]  ;;  %s364_s1 = smov [#allocation2]  }
  0x29   :  { %s321_s16 = sshll.u32 %s364_s1, 4  ;;  %s322_s16 = int_to_ptr.vmem [resolvable:$true] %s321_s16 }
  0x2a   :  { %s339_s17 = scalar_lea.vmem %s322_s16, 256  ;;  %p344_p1 = scmp.lt.s32.totalorder %s322_s16, %s322_s16 }
  0x2b   :  { %p340_p0 = scmp.ne.s32.totalorder %s322_s16, %s339_s17  ;;  %p345_p2 = scmp.lt.s32.totalorder %s339_s17, %s339_s17 }
  0x2c   :  { %254 = vperm.xlu1 %338, %v252_v25   ;;  %247 = vperm.xlu0 %337, %v245_v26  }
  0x2d   :  { %p346_p3 = por %p345_p2, %p344_p1 }
  0x2f   :  { %p347_p4 = pnand %p346_p3, %p340_p0 }
  0x30   :  { %268 = vperm.xlu1 %338, %v266_v27   ;;  %261 = vperm.xlu0 %337, %v259_v28  }
  0x34   :  { %282 = vperm.xlu1 %338, %v280_v29   ;;  %275 = vperm.xlu0 %337, %v273_v30   ;;  %v105_v29 = vrot.slane %v12_v56, %v104_v21  ;;  %v116_v30 = vrot.slane %v13_v24, %v27_v55  ;;  %v193_v56 = vrot.slane %v13_v24, %v104_v21 }
  0x38   :  { %289 = vperm.xlu1 %338, %v287_v31   ;;  %154 = vperm.xlu0 %337, %v152_v32  }
  0x3c   :  { %296 = vperm.xlu1 %338, %v294_v33   ;;  %165 = vperm.xlu0 %337, %v163_v34  }
  0x40   :  { %303 = vperm.xlu1 %338, %v301_v35   ;;  %176 = vperm.xlu0 %337, %v174_v36  }
  0x44   :  { %310 = vperm.xlu1 %338, %v308_v37   ;;  %187 = vperm.xlu0 %337, %v185_v38   ;;  %v127_v37 = vrot.slane %v13_v24, %v38_v57  ;;  %v138_v38 = vrot.slane %v13_v24, %v49_v61 }
  0x87   :  { %v45_v39 = vpop.permute.xlu1 %44  ;;  %v23_v40 = vpop.permute.xlu0 %22 }
  0x88   :  { %vm24_vm4 = vcmp.eq.s32.totalorder %v23_v40, 1  ;;  %vm46_vm8 = vcmp.eq.s32.totalorder %v45_v39, 1 }
  0x89   :  { %v29_v2 = vsel %vm24_vm4, %v28_v60, 0.0 }
  0x8b   :  { %v56_v41 = vpop.permute.xlu1 %55  ;;  %v34_v42 = vpop.permute.xlu0 %33 }
  0x8c   :  { %vm35_vm5 = vcmp.eq.s32.totalorder %v34_v42, 1  ;;  %vm57_vm10 = vcmp.eq.s32.totalorder %v56_v41, 1 }
  0x8d   :  { %v40_v4 = vsel %vm35_vm5, %v39_v62, %v29_v2 }
  0x8e   :  { %v51_v10 = vsel %vm46_vm8, %v50_v3, %v40_v4 }
  0x8f   :  { %v458_v43 = vpop.permute.xlu1 %77  ;;  %v67_v44 = vpop.permute.xlu0 %66  ;;  %v62_v16 = vsel %vm57_vm10, %v61_v7, %v51_v10 }
  0x90   :  { %vm68_vm12 = vcmp.eq.s32.totalorder %v67_v44, 1  ;;  %vm79_vm14 = vcmp.eq.s32.totalorder %v458_v43, 1 }
  0x91   :  { %v73_v23 = vsel %vm68_vm12, %v72_v14, %v62_v16 }
  0x92   :  { %v84_v28 = vsel %vm79_vm14, %v83_v19, %v73_v23 }
  0x93   :  { %v460_v45 = vpop.permute.xlu1 %99  ;;  %v462_v46 = vpop.permute.xlu0 %88 }
  0x94   :  { %vm90_vm0 = vcmp.eq.s32.totalorder %v462_v46, 1  ;;  %vm101_vm2 = vcmp.eq.s32.totalorder %v460_v45, 1  ;;  %v149_v46 = vrot.slane %v13_v24, %v60_v63 }
  0x95   :  { %v95_v32 = vsel %vm90_vm0, %v94_v20, %v84_v28 }
  0x96   :  { %v106_v36 = vsel %vm101_vm2, %v105_v29, %v95_v32 }
  0x97   :  { %v464_v47 = vpop.permute.xlu1 %121  ;;  %v466_v48 = vpop.permute.xlu0 %110 }
  0x98   :  { %vm112_vm4 = vcmp.eq.s32.totalorder %v466_v48, 1  ;;  %v160_v48 = vrot.slane %v13_v24, %v71_v5 }
  0x99   :  { %v117_v40 = vsel %vm112_vm4, %v116_v30, %v106_v36 }
  0x9b   :  { %v468_v50 = vpop.permute.xlu1 %143  ;;  %v470_v51 = vpop.permute.xlu0 %132 }
  0x9c   :  { %vm134_vm8 = vcmp.eq.s32.totalorder %v470_v51, 1  ;;  %vm145_vm10 = vcmp.eq.s32.totalorder %v468_v50, 1  ;;  %v182_v51 = vrot.slane %v13_v24, %v93_v12 }
  0x9f   :  { %v213_v53 = vpop.permute.xlu1 %212  ;;  %v206_v54 = vpop.permute.xlu0 %205 }
  0xa0   :  { %vm207_vm6 = vcmp.eq.s32.totalorder %v206_v54, 1  ;;  %vm214_vm7 = vcmp.eq.s32.totalorder %v213_v53, 1 }
  0xa1   :  { %v208_v6 = vsel %vm207_vm6, %v28_v60, 0.0  ;;  %vm123_vm6 = vcmp.eq.s32.totalorder %v464_v47, 1  ;;  %v171_v47 = vrot.slane %v13_v24, %v82_v11 }
  0xa2   :  { %v215_v13 = vsel %vm214_vm7, %v39_v62, %v208_v6  ;;  %v128_v44 = vsel %vm123_vm6, %v127_v37, %v117_v40 }
  0xa3   :  { %v227_v58 = vpop.permute.xlu1 %226  ;;  %v220_v59 = vpop.permute.xlu0 %219  ;;  %v139_v49 = vsel %vm134_vm8, %v138_v38, %v128_v44 }
  0xa4   :  { %vm221_vm9 = vcmp.eq.s32.totalorder %v220_v59, 1  ;;  %vm228_vm11 = vcmp.eq.s32.totalorder %v227_v58, 1  ;;  %v150_v58 = vsel %vm145_vm10, %v149_v46, %v139_v49 }
  0xa5   :  { %v222_v15 = vsel %vm221_vm9, %v50_v3, %v215_v13 }
  0xa6   :  { %v229_v22 = vsel %vm228_vm11, %v61_v7, %v222_v15 }
  0xa7   :  { %v241_v0 = vpop.permute.xlu1 %240  ;;  %v234_v1 = vpop.permute.xlu0 %233 }
  0xa8   :  { %vm235_vm13 = vcmp.eq.s32.totalorder %v234_v1, 1  ;;  %vm242_vm15 = vcmp.eq.s32.totalorder %v241_v0, 1 }
  0xa9   :  { %v236_v25 = vsel %vm235_vm13, %v72_v14, %v229_v22 }
  0xaa   :  { %v243_v31 = vsel %vm242_vm15, %v83_v19, %v236_v25 }
  0xab   :  { %v255_v8 = vpop.permute.xlu1 %254  ;;  %v248_v9 = vpop.permute.xlu0 %247 }
  0xac   :  { %vm249_vm1 = vcmp.eq.s32.totalorder %v248_v9, 1  ;;  %vm256_vm3 = vcmp.eq.s32.totalorder %v255_v8, 1 }
  0xad   :  { %v250_v33 = vsel %vm249_vm1, %v94_v20, %v243_v31 }
  0xae   :  { %v257_v39 = vsel %vm256_vm3, %v105_v29, %v250_v33 }
  0xaf   :  { %v269_v17 = vpop.permute.xlu1 %268  ;;  %v262_v18 = vpop.permute.xlu0 %261 }
  0xb0   :  { %vm263_vm5 = vcmp.eq.s32.totalorder %v262_v18, 1  ;;  %vm270_vm7 = vcmp.eq.s32.totalorder %v269_v17, 1 }
  0xb1   :  { %v264_v41 = vsel %vm263_vm5, %v116_v30, %v257_v39 }
  0xb2   :  { %v271_v45 = vsel %vm270_vm7, %v127_v37, %v264_v41 }
  0xb3   :  { %v283_v26 = vpop.permute.xlu1 %282  ;;  %v276_v27 = vpop.permute.xlu0 %275 }
  0xb4   :  { %vm277_vm9 = vcmp.eq.s32.totalorder %v276_v27, 1  ;;  %vm284_vm11 = vcmp.eq.s32.totalorder %v283_v26, 1 }
  0xb5   :  { %v278_v53 = vsel %vm277_vm9, %v138_v38, %v271_v45 }
  0xb6   :  { %v285_v57 = vsel %vm284_vm11, %v149_v46, %v278_v53 }
  0xb7   :  { %v290_v34 = vpop.permute.xlu1 %289  ;;  %v155_v35 = vpop.permute.xlu0 %154 }
  0xb8   :  { %vm291_vm12 = vcmp.eq.s32.totalorder %v290_v34, 1  ;;  %vm156_vm13 = vcmp.eq.s32.totalorder %v155_v35, 1 }
  0xb9   :  { %v292_v59 = vsel %vm291_vm12, %v160_v48, %v285_v57  ;;  %v161_v60 = vsel %vm156_vm13, %v160_v48, %v150_v58 }
  0xbb   :  { %v297_v42 = vpop.permute.xlu1 %296  ;;  %v166_v43 = vpop.permute.xlu0 %165 }
  0xbc   :  { %vm298_vm14 = vcmp.eq.s32.totalorder %v297_v42, 1  ;;  %vm167_vm15 = vcmp.eq.s32.totalorder %v166_v43, 1 }
  0xbd   :  { %v299_v61 = vsel %vm298_vm14, %v171_v47, %v292_v59  ;;  %v172_v62 = vsel %vm167_vm15, %v171_v47, %v161_v60 }
  0xbf   :  { %v304_v54 = vpop.permute.xlu1 %303  ;;  %v177_v55 = vpop.permute.xlu0 %176 }
  0xc0   :  { %vm305_vm0 = vcmp.eq.s32.totalorder %v304_v54, 1  ;;  %vm178_vm1 = vcmp.eq.s32.totalorder %v177_v55, 1 }
  0xc1   :  { %v306_v1 = vsel %vm305_vm0, %v182_v51, %v299_v61  ;;  %v183_v2 = vsel %vm178_vm1, %v182_v51, %v172_v62 }
  0xc3   :  { %v311_v63 = vpop.permute.xlu1 %310  ;;  %v188_v0 = vpop.permute.xlu0 %187 }
  0xc4   :  { %vm312_vm2 = vcmp.eq.s32.totalorder %v311_v63, 1  ;;  %vm189_vm3 = vcmp.eq.s32.totalorder %v188_v0, 1 }
  0xc5   :  { %v313_v52 = vsel %vm312_vm2, %v193_v56, %v306_v1  ;;  %v194_v3 = vsel %vm189_vm3, %v193_v56, %v183_v2 }
  0xc6   :  { %315 = vst [vmem:[#allocation2 + $0x8] sm:$0xff] %v313_v52  ;;  %195 = vst [vmem:[#allocation2] sm:$0xff] %v194_v3 }
  0xc7   :  { %350 = shalt.err (!%p347_p4)
}
  0xc8   :  { %s351_s20 = scalar_lea.hbm %s523_s2, 256 }
  0xc9   :  { %p352_p5 = scmp.ne.s32.totalorder %s523_s2, %s351_s20  ;;  %p355_p6 = scmp.lt.u32.totalorder %s351_s20, %s523_s2 }
  0xcb   :  { %p357_p7 = pnand %p355_p6, %p352_p5 }
  0xcd   :  { %360 = shalt.err (!%p357_p7)
}
  0xce   :  { %s365_s25 = smov 128   ;;  %s366_s26 = smov 8  }
  0xcf   :  { %327 = dma.vmem_to_hbm [thread:$0]  %s322_s16, 256, %s523_s2, [#allocation3], %s365_s25, %s365_s25, %s366_s26  }
  0xd0   :  { %361 = dma.done.wait [#allocation3], 256  }
  0xd1   :  { %362 = vsyncadd [#allocation3], 4294967040 }
  0xd2   :  { %331 = vsyncpa [#allocation3], 1 }

</bundles_post_ra>
